<compile_context>
chip_gen: v7x
topology: tpu7x:2x2x1
jax: 0.10.0
libtpu: 0.0.40
codegen_flags: <defaults>
</compile_context>

<pallas_src>
import jax
import jax.numpy as jnp
from jax.experimental import pallas as pl
from jax.experimental.pallas import tpu as pltpu


# ----------------------------------------------------------------------------
# Pallas kernel
# ----------------------------------------------------------------------------
def _mlp_proj_kernel(x_ref, w_ref, b_ref, o_ref):
    # x_ref: (1, C, tile_n)   w_ref: (C, E)   b_ref: (1, E)   o_ref: (1, tile_n, E)
    x = x_ref[0]  # (C, tile_n), spatial on lanes
    # Contract over C (dim 0 of both operands) == x^T @ w on the MXU.  This
    # fuses the NCHW->NHWC transpose into the matmul instead of an HBM reshape.
    acc = jax.lax.dot_general(
        x, w_ref[...],
        dimension_numbers=(((0,), (0,)), ((), ())),
        preferred_element_type=jnp.float32,
    )  # (tile_n, E), f32 accumulation
    # Bias add in f32 on the VPU (keeps epilogue f32 on v5e), then downcast.
    acc = acc + b_ref[...].astype(jnp.float32)
    o_ref[0] = acc.astype(o_ref.dtype)


# ----------------------------------------------------------------------------
# Wrapper
# ----------------------------------------------------------------------------
def _round_up(x, m):
    return ((x + m - 1) // m) * m


def _pick_tile_n(n128, c, e, in_itemsize, out_itemsize,
                 budget_bytes=32 * 1024 * 1024, max_tile=2048):
    """Spatial tile: largest 128-multiple under a VMEM budget that divides n128.

    Budget accounts for double-buffered input/output blocks, the resident
    weight/bias buffers and the f32 matmul intermediate; conservative enough
    for v7x's 64 MiB physical VMEM once compiler scratch is added.  Preferring
    a divisor of the 128-rounded spatial size keeps every block full (no big
    HBM padding copy, no masked stores on the edge block).
    """
    fixed = 2 * (c * e + e) * in_itemsize                  # weight + bias buffers
    per128 = 128 * (2 * c * in_itemsize                    # x block (double-buffered)
                    + 2 * e * out_itemsize                 # out block (double-buffered)
                    + 4 * e)                               # f32 matmul intermediate
    units = max(1, int((budget_bytes - fixed) // max(per128, 1)))
    cap = max(128, min(units * 128, max_tile, n128))
    cap = (cap // 128) * 128
    for t in range(cap, 127, -128):                        # largest divisor <= cap
        if n128 % t == 0:
            return t
    return 128


def mlp_proj_pallas(x_bcn, w_ce, bias_e, *, tile_n=None, out_dtype=None,
                    vmem_limit_bytes=64 * 1024 * 1024):
    """x_bcn: (B, C, N) NCHW-flattened features; w_ce: (C, E); bias_e: (E,).

    Returns (B, N, E) == Linear(x.flatten(2).transpose(1, 2)).
    """
    B, C, N = x_bcn.shape
    Cw, E = w_ce.shape
    assert Cw == C, "weight/channel mismatch"
    if out_dtype is None:
        out_dtype = x_bcn.dtype

    n128 = _round_up(N, 128)
    if tile_n is None:
        tile_n = _pick_tile_n(n128, C, E,
                              jnp.dtype(x_bcn.dtype).itemsize,
                              jnp.dtype(out_dtype).itemsize)
    n_pad = _round_up(n128, tile_n)
    if n_pad != N:
        # Only hit when H*W is not a multiple of 128 (tile_n divides n128 by
        # construction); padded rows are sliced off below.
        x_bcn = jnp.pad(x_bcn, ((0, 0), (0, 0), (0, n_pad - N)))

    bias_2d = bias_e.reshape(1, E)
    grid = (B, n_pad // tile_n)

    in_isz = jnp.dtype(x_bcn.dtype).itemsize
    out_isz = jnp.dtype(out_dtype).itemsize
    cost = pl.CostEstimate(
        flops=int(2 * B * n_pad * C * E),
        transcendentals=0,
        bytes_accessed=int(B * n_pad * C * in_isz
                           + C * E * jnp.dtype(w_ce.dtype).itemsize
                           + B * n_pad * E * out_isz),
    )

    out = pl.pallas_call(
        _mlp_proj_kernel,
        out_shape=jax.ShapeDtypeStruct((B, n_pad, E), out_dtype),
        grid_spec=pltpu.PrefetchScalarGridSpec(
            num_scalar_prefetch=0,
            grid=grid,
            in_specs=[
                pl.BlockSpec((1, C, tile_n), lambda b, j: (b, 0, j)),  # lane-dense input
                pl.BlockSpec((C, E), lambda b, j: (0, 0)),             # resident weight
                pl.BlockSpec((1, E), lambda b, j: (0, 0)),             # resident bias
            ],
            out_specs=pl.BlockSpec((1, tile_n, E), lambda b, j: (b, j, 0)),  # lane-dense out
        ),
        compiler_params=pltpu.CompilerParams(
            dimension_semantics=("parallel", "parallel"),
            vmem_limit_bytes=vmem_limit_bytes,
        ),
        cost_estimate=cost,
    )(x_bcn, w_ce, bias_2d)

    if n_pad != N:
        out = out[:, :N, :]
    return out


# ----------------------------------------------------------------------------
# MLP module (SegFormer Linear Embedding) in JAX
# ----------------------------------------------------------------------------
class MLPJAX:
    """JAX/Pallas equivalent of SegFormer's MLP: Linear over flattened spatial dims."""

    def __init__(self, input_dim=2048, embed_dim=768, *, key=None,
                 dtype=jnp.float32, compute_dtype=None):
        if key is None:
            key = jax.random.PRNGKey(42)
        kw, kb = jax.random.split(key)
        bound = 1.0 / (input_dim ** 0.5)
        # PyTorch nn.Linear stores weight as (embed_dim, input_dim); we keep the
        # transposed (input_dim, embed_dim) layout for the MXU matmul.
        # TODO(synk): transpose the weight when loading a PyTorch checkpoint.
        self.weight = jax.random.uniform(kw, (input_dim, embed_dim), dtype,
                                         minval=-bound, maxval=bound)
        self.bias = jax.random.uniform(kb, (embed_dim,), dtype,
                                       minval=-bound, maxval=bound)
        self.input_dim = input_dim
        self.embed_dim = embed_dim
        # Set to jnp.bfloat16 on v6e/v7x to halve HBM traffic (f32 accumulation
        # and f32 bias add are preserved inside the kernel).
        self.compute_dtype = compute_dtype

    def forward(self, x):
        # x: (B, C, *spatial).  PyTorch: x.flatten(2).transpose(1, 2) -> proj.
        B, C = x.shape[0], x.shape[1]
        assert C == self.input_dim
        orig_dtype = x.dtype
        x_bcn = x.reshape(B, C, -1)  # flatten(2); the transpose is fused in-kernel
        w = self.weight
        if self.compute_dtype is not None:
            x_bcn = x_bcn.astype(self.compute_dtype)
            w = w.astype(self.compute_dtype)
        return mlp_proj_pallas(x_bcn, w, self.bias, out_dtype=orig_dtype)

    __call__ = forward


# ----------------------------------------------------------------------------
# Demo / self-test
# ----------------------------------------------------------------------------
if __name__ == "__main__":
    key = jax.random.PRNGKey(0)
    k_x1, k_x2, k_p = jax.random.split(key, 3)

    input_dim, embed_dim = 64, 256
    mlp = MLPJAX(input_dim=input_dim, embed_dim=embed_dim, key=k_p)

    def reference(x):
        x_flat = x.reshape(x.shape[0], x.shape[1], -1)   # (B, C, N)  == flatten(2)
        x_t = jnp.transpose(x_flat, (0, 2, 1))           # (B, N, C)  == transpose(1, 2)
        return x_t @ mlp.weight + mlp.bias               # (B, N, E)

    # Case 1: lane-aligned spatial size (H*W = 256).
    x1 = jax.random.normal(k_x1, (2, input_dim, 16, 16), dtype=jnp.float32)
    out1 = jax.block_until_ready(mlp(x1))
    assert out1.shape == (2, 16 * 16, embed_dim)
    assert jnp.allclose(out1, reference(x1), atol=1e-4, rtol=1e-4)

    # Case 2: ragged spatial size (H*W = 225, padded to 256 internally).
    x2 = jax.random.normal(k_x2, (2, input_dim, 15, 15), dtype=jnp.float32)
    out2 = jax.block_until_ready(mlp(x2))
    assert out2.shape == (2, 15 * 15, embed_dim)
    assert jnp.allclose(out2, reference(x2), atol=1e-4, rtol=1e-4)

    print("KERNEL_OK")
</pallas_src>

<mosaic_0001>
module attributes {stable_mosaic.version = 11 : i64} {
  func.func @_mlp_proj_kernel(%arg0: i32, %arg1: i32, %arg2: memref<1x64x256xf32, #tpu.memory_space<vmem>>, %arg3: memref<64x256xf32, #tpu.memory_space<vmem>>, %arg4: memref<1x256xf32, #tpu.memory_space<vmem>>, %arg5: memref<1x256x256xf32, #tpu.memory_space<vmem>>) attributes {dimension_semantics = [#tpu.dimension_semantics<parallel>, #tpu.dimension_semantics<parallel>], iteration_bounds = array<i64: 2, 1>, scalar_prefetch = 0 : i64, scratch_operands = 0 : i64, tpu.core_type = #tpu.core_type<tc>, window_params = [{transform_indices = @transform_0, window_bounds = array<i64: 1, 64, 256>}, {pipeline_mode = #tpu.pipeline_mode<synchronous>, transform_indices = @transform_1, window_bounds = array<i64: 64, 256>}, {pipeline_mode = #tpu.pipeline_mode<synchronous>, transform_indices = @transform_2, window_bounds = array<i64: 1, 256>}, {transform_indices = @transform_3, window_bounds = array<i64: 1, 256, 256>}]} {
    %c0 = arith.constant 0 : index
    %c0_0 = arith.constant 0 : index
    %c0_1 = arith.constant 0 : index
    %0 = vector.load %arg2[%c0, %c0_0, %c0_1] : memref<1x64x256xf32, #tpu.memory_space<vmem>>, vector<1x64x256xf32>
    %1 = vector.shape_cast %0 : vector<1x64x256xf32> to vector<64x256xf32>
    %c0_2 = arith.constant 0 : index
    %c0_3 = arith.constant 0 : index
    %2 = vector.load %arg3[%c0_2, %c0_3] : memref<64x256xf32, #tpu.memory_space<vmem>>, vector<64x256xf32>
    %cst = arith.constant dense<0.000000e+00> : vector<256x256xf32>
    %3 = tpu.matmul %1, %2, %cst {dimension_numbers = #tpu.dot_dimension_numbers<[0], [0], [1], [1], [0, 1, 1, 1], [], []>} : vector<64x256xf32>, vector<64x256xf32>, vector<256x256xf32> -> vector<256x256xf32>
    %c0_4 = arith.constant 0 : index
    %c0_5 = arith.constant 0 : index
    %4 = vector.load %arg4[%c0_4, %c0_5] : memref<1x256xf32, #tpu.memory_space<vmem>>, vector<1x256xf32>
    %5 = vector.broadcast %4 : vector<1x256xf32> to vector<256x256xf32>
    %6 = arith.addf %3, %5 : vector<256x256xf32>
    %c0_6 = arith.constant 0 : index
    %c0_7 = arith.constant 0 : index
    %c0_8 = arith.constant 0 : index
    %7 = vector.load %arg5[%c0_6, %c0_7, %c0_8] : memref<1x256x256xf32, #tpu.memory_space<vmem>>, vector<1x256x256xf32>
    %8 = vector.shape_cast %7 : vector<1x256x256xf32> to vector<256x256xf32>
    %9 = vector.shape_cast %6 : vector<256x256xf32> to vector<1x256x256xf32>
    tpu.vector_store %arg5[%c0_6, %c0_7, %c0_8], %9 {strides = array<i32>} : memref<1x256x256xf32, #tpu.memory_space<vmem>>, vector<1x256x256xf32>,
    return
  }
  func.func @transform_0(%arg0: i32, %arg1: i32) -> (i32, i32, i32) {
    %c0_i32 = arith.constant 0 : i32
    %c0_i32_0 = arith.constant 0 : i32
    return %arg0, %c0_i32, %arg1 : i32, i32, i32
  }
  func.func @transform_1(%arg0: i32, %arg1: i32) -> (i32, i32) {
    %c0_i32 = arith.constant 0 : i32
    %c0_i32_0 = arith.constant 0 : i32
    %c0_i32_1 = arith.constant 0 : i32
    return %c0_i32, %c0_i32_0 : i32, i32
  }
  func.func @transform_2(%arg0: i32, %arg1: i32) -> (i32, i32) {
    %c0_i32 = arith.constant 0 : i32
    %c0_i32_0 = arith.constant 0 : i32
    %c0_i32_1 = arith.constant 0 : i32
    return %c0_i32, %c0_i32_0 : i32, i32
  }
  func.func @transform_3(%arg0: i32, %arg1: i32) -> (i32, i32, i32) {
    %c0_i32 = arith.constant 0 : i32
    %c0_i32_0 = arith.constant 0 : i32
    return %arg0, %arg1, %c0_i32 : i32, i32, i32
  }
}

</mosaic_0001>

<bundles_post_ra>
// kernel: tpu_custom_call.1
= control target key start
LH: loop header
LB: loop body
LE: loop exit
PB: predicated region body
PF: predicated region fallthrough
CT: control target
= control target key end

     0   :  { %8 = vsyncpa [#allocation3], 0  ;;  %s1732_s0 = inlined_call_operand.hbm [shape: f32[2,64,256], index: 0, kind: input, shape index: {}]   ;;  %s1733_s1 = inlined_call_operand.hbm [shape: f32[64,256], index: 1, kind: input, shape index: {}]   ;;  %s1734_s2 = inlined_call_operand.hbm [shape: f32[1,256], index: 2, kind: input, shape index: {}]   ;;  %s1735_s3 = inlined_call_operand.hbm [shape: f32[2,256,256], index: 3, kind: output, shape index: {}]  }
   0x1   :  { %10 = vsyncpa [#allocation3 + $0x1], 0 }
   0x2   :  { %11 = vsyncpa [#allocation6], 0 }
   0x3   :  { %12 = vsyncpa [#allocation4], 0 }
   0x4   :  { %14 = vsyncpa [#allocation4 + $0x1], 0  ;;  %s1253_s12 = smov 0   ;;  %s1255_s13 = smov 0  }
   0x5   :  { %s1257_s14 = smov 0   ;;  %s1259_s15 = smov 0  }
   0x6   :  { %s1261_s16 = smov 0   ;;  %s1263_s17 = smov 0  }
   0x7 LB: > { %s885_s18 = sadd.s32 4294967295, %s1222_s17   ;;  %s886_s19 = sadd.s32 4294967294, %s1222_s17   ;;  %s1222_s17 = sphi %s1263_s17, %s20_s17   ;;  %s1218_s16 = sphi %s1261_s16, %s1757_s16   ;;  %s1214_s15 = sphi %s1259_s15, %s1756_s15   ;;  %s1210_s14 = sphi %s1257_s14, %s1755_s14   ;;  %s1206_s13 = sphi %s1255_s13, %s1754_s13   ;;  %s1202_s12 = sphi %s1253_s12, %s1753_s12  }
   0x8   : > { %p54_p0 = scmp.ne.s32.totalorder %s1206_s13, %s1202_s12  ;;  %p1287_p1 = scmp.eq.s32.totalorder %s885_s18, 0 }
   0x9   : > { %p1291_p2 = scmp.eq.s32.totalorder %s885_s18, 1  ;;  %p128_p3 = scmp.eq.s32.totalorder %s886_s19, 1 }
   0xa   : > { %s1740_s20 = scalar_select %p1287_p1, 1, 0 }
   0xb   : > { %p1297_p4 = por %p1287_p1, %p54_p0  ;;  %p887_p5 = scmp.ge.s32.totalorder %s1222_s17, 1 }
   0xc   : > { %p1302_p6 = por %p128_p3, %p54_p0  ;;  %p135_p7 = scmp.lt.s32.totalorder %s1222_s17, 3 }
   0xd   : > { %s1742_s22 = scalar_select %p1297_p4, 1, 0 }
   0xe   : > { %s1743_s23 = scalar_select %p1302_p6, 1, 0 }
   0xf   : > { %p1307_p8 = pnand %p887_p5, %p135_p7  ;;  %s1224_s25 = smov [#allocation5]  }
  0x10   : > { %s147_s26 = sshll.u32 %s1224_s25, 4  ;;  %s1225_s28 = smov [#allocation7]   ;;  %s1311_s26 = int_to_ptr.vmem [resolvable:$true] %s147_s26 }
  0x11   : > { %p974_p9 = pneg %p1307_p8  ;;  %s161_s29 = sshll.u32 %s1225_s28, 4  ;;  %s1322_s29 = int_to_ptr.vmem [resolvable:$true] %s161_s29 }
  0x12   : > { %s1050_s5 = scalar_lea.hbm %s1733_s1, 2048 }
  0x13   : > { %p1318_p11 = pnand %p974_p9, %p1287_p1  ;;  %p1051_p12 = scmp.ne.s32.totalorder %s1733_s1, %s1050_s5 }
  0x14   : > { %p1057_p5 = scmp.lt.u32.totalorder %s1050_s5, %s1733_s1 }
  0x15   : > { %p1052_p13 = pneg %p1318_p11 }
  0x17   : > { %p1053_p0 = pnand %p1052_p13, %p1051_p12 }
  0x19   : > { %p1054_p3 = pneg %p1053_p0 }
  0x1b   : > { %p1059_p7 = pnand %p1057_p5, %p1054_p3 }
  0x1d   : > { %1062 = shalt.err (!%p1059_p7)
}
  0x1e   : > { %s1063_s10 = scalar_lea.vmem %s1311_s26, 2048  ;;  %p1071_p1 = scmp.lt.s32.totalorder %s1311_s26, %s1311_s26 }
  0x1f   : > { %p1064_p9 = scmp.ne.s32.totalorder %s1311_s26, %s1063_s10  ;;  %p1072_p12 = scmp.lt.s32.totalorder %s1063_s10, %s1063_s10 }
  0x21   : > { %p1066_p10 = pnand %p1064_p9, %p1052_p13  ;;  %p1073_p0 = por %p1072_p12, %p1071_p1 }
  0x23   : > { %p1067_p6 = pneg %p1066_p10 }
  0x25   : > { %p1074_p4 = pnand %p1073_p0, %p1067_p6 }
  0x27   : > { %1077 = shalt.err (!%p1074_p4)
}
  0x28   : > { %s1226_s11 = smov 256   ;;  %s1227_s18 = smov 16  }
  0x29   : > { %977 = dma.hbm_to_vmem [thread:$0]  (!%p1318_p11), %s1733_s1, 2048, %s1311_s26, [#allocation6], %s1226_s11, %s1226_s11, %s1227_s18  }
  0x2a   : > { %s1078_s4 = scalar_lea.hbm %s1734_s2, 32 }
  0x2b   : > { %p1079_p1 = scmp.ne.s32.totalorder %s1734_s2, %s1078_s4  ;;  %p1085_p10 = scmp.lt.u32.totalorder %s1078_s4, %s1734_s2 }
  0x2d   : > { %p1081_p4 = pnand %p1079_p1, %p1052_p13 }
  0x2f   : > { %p1082_p6 = pneg %p1081_p4 }
  0x31   : > { %p1087_p3 = pnand %p1085_p10, %p1082_p6 }
  0x33   : > { %1090 = shalt.err (!%p1087_p3)
}
  0x34   : > { %s1091_s26 = scalar_lea.vmem %s1322_s29, 32  ;;  %p1099_p12 = scmp.lt.s32.totalorder %s1322_s29, %s1322_s29 }
  0x35   : > { %p1092_p5 = scmp.ne.s32.totalorder %s1322_s29, %s1091_s26  ;;  %p1100_p0 = scmp.lt.s32.totalorder %s1091_s26, %s1091_s26 }
  0x37   : > { %p1094_p7 = pnand %p1092_p5, %p1052_p13  ;;  %p1101_p1 = por %p1100_p0, %p1099_p12 }
  0x39   : > { %p1095_p9 = pneg %p1094_p7 }
  0x3b   : > { %p1102_p4 = pnand %p1101_p1, %p1095_p9 }
  0x3d   : > { %1105 = shalt.err (!%p1102_p4)
}
  0x3e   : > { %980 = dma.hbm_to_vmem [thread:$0]  (!%p1318_p11), %s1734_s2, 32, %s1322_s29, [#allocation6]  }
  0x3f   : > { %s32_s19 = sadd.s32 1, %s1218_s16  ;;  %s41_s25 = sadd.s32 1, %s1210_s14 }
  0x40   : > { %p34_p13 = scmp.ge.s32.totalorder %s32_s19, 2  ;;  %p48_p6 = scmp.ne.s32.totalorder %s1210_s14, %s1206_s13 }
  0x41   : > { %p49_p10 = scmp.eq.s32.totalorder %s1222_s17, 0  ;;  %p991_p3 = scmp.lt.s32.totalorder %s1222_s17, 2 }
  0x42   : > { %s1759_s19 = smov (%p34_p13, %s32_s19), 0  ;;  %p1389_p7 = por %p1291_p2, %p48_p6 }
  0x43   : > { %p50_p5 = por %p49_p10, %p48_p6  ;;  %s36_s28 = ssub.s32 %s1218_s16, %s1759_s19 }
  0x44   : > { %s1746_s27 = scalar_select %p1389_p7, 1, 0 }
  0x45   : > { %s172_s30 = sand.u32 1, %s1210_s14   ;;  %p39_p9 = scmp.eq.s32.totalorder %s36_s28, 0 }
  0x46   : > { %s891_s29 = sshll.u32 %s172_s30, 7  ;;  %s936_s4 = sshll.u32 %s1218_s16, 11 }
  0x47   : > { %s1398_s5 = scalar_select %p39_p9, %s1210_s14, %s41_s25  }
  0x48   : > { %s1403_s8 = scalar_lea.hbm %s1732_s0, %s936_s4  ;;  %s176_s21 = scalar_lea.vmem [#allocation2], %s891_s29 }
  0x49   : > { %s185_s26 = sshll.u32 %s176_s21, 4  ;;  %p1407_p2 = pnand %p991_p3, %p50_p5  ;;  %s1411_s26 = int_to_ptr.vmem [resolvable:$true] %s185_s26 }
  0x4a   : > { %s1413_s10 = scalar_lea.sflag [#allocation3], %s172_s30  ;;  %s1106_s25 = scalar_lea.hbm %s1403_s8, 2048 }
  0x4b   : > { %p1107_p11 = scmp.ne.s32.totalorder %s1403_s8, %s1106_s25  ;;  %p1108_p12 = pneg %p1407_p2 }
  0x4c   : > { %s1111_s4 = scalar_lea.hbm %s1732_s0, 4096  ;;  %p1112_p4 = scmp.lt.u32.totalorder %s1403_s8, %s1732_s0 }
  0x4d   : > { %p1109_p0 = pnand %p1108_p12, %p1107_p11  ;;  %p1113_p13 = scmp.lt.u32.totalorder %s1111_s4, %s1106_s25 }
  0x4e   : > { %p1115_p10 = scmp.lt.u32.totalorder %s1106_s25, %s1403_s8 }
  0x4f   : > { %p1110_p1 = pneg %p1109_p0  ;;  %p1114_p6 = por %p1113_p13, %p1112_p4 }
  0x51   : > { %p1116_p3 = por %p1115_p10, %p1114_p6 }
  0x53   : > { %p1117_p5 = pnand %p1116_p3, %p1110_p1 }
  0x55   : > { %1120 = shalt.err (!%p1117_p5)
}
  0x56   : > { %s1121_s30 = scalar_lea.vmem %s1411_s26, 2048  ;;  %s1228_s21 = smov [#allocation2]  }
  0x57   : > { %p1122_p9 = scmp.ne.s32.totalorder %s1411_s26, %s1121_s30  ;;  %s1126_s28 = sshll.u32 %s1228_s21, 4  ;;  %s1127_s28 = int_to_ptr.vmem [resolvable:$false] %s1126_s28 }
  0x58   : > { %s1128_s29 = scalar_lea.vmem %s1127_s28, 4096  ;;  %p1129_p7 = scmp.lt.s32.totalorder %s1411_s26, %s1127_s28 }
  0x59   : > { %p1124_p11 = pnand %p1122_p9, %p1108_p12  ;;  %p1130_p4 = scmp.lt.s32.totalorder %s1128_s29, %s1121_s30 }
  0x5b   : > { %p1125_p0 = pneg %p1124_p11  ;;  %p1131_p13 = por %p1130_p4, %p1129_p7 }
  0x5d   : > { %p1132_p6 = pnand %p1131_p13, %p1125_p0 }
  0x5f   : > { %1135 = shalt.err (!%p1132_p6)
}
  0x60   : > { %984 = dma.hbm_to_vmem [thread:$0]  (!%p1407_p2), %s1403_s8, 2048, %s1411_s26, %s1413_s10, %s1226_s11, %s1226_s11, %s1227_s18  }
  0x61   : > { %197 = sbr.rel (%p1307_p8) target bundleno = 529 (0x211), region = 32  ;;  %s1447_s25 = sand.u32 (!%p1307_p8), 1, %s1206_s13  }
  0x62   : > { %s895_s4 = sshll.u32 (!%p1307_p8), %s1447_s25, 7  ;;  %s200_s6 = scalar_lea.sflag (!%p1307_p8), [#allocation3], %s1447_s25 }
  0x63   : > { %s1451_s7 = scalar_lea.vmem (!%p1307_p8), [#allocation2], %s895_s4  ;;  %p1748_p7 = scmp.ne.s32.totalorder (!%p1307_p8), %s1742_s22, 0 }
  0x68   : > { %1189 = dma.done.wait (%p1748_p7), %s200_s6, 2048  }
  0x69   : > { %1191 = vsyncadd (%p1748_p7), %s200_s6, 4294965248  ;;  %p1749_p2 = scmp.ne.s32.totalorder %s1740_s20, 0 }
  0x6b   : > { %1193 = dma.done.wait (%p1749_p2), [#allocation6], 2080  }
  0x6c   : > { %1195 = vsyncadd (%p1749_p2), [#allocation6], 4294965216  ;;  %v1229_v0 = vmov 0.0   ;;  %v237_v1 = vld [vmem:[%s1451_s7 + $0x8] sm:$0xff]  ;;  %v236_v2 = vld [vmem:[%s1451_s7] sm:$0xff]  ;;  %vm344_vm0 = vcmask 523264  }
  0x6d   : > { %505 = vmatprep.mubr.f32.mxu0 %v1229_v0  ;;  %601 = vmatprep.mubr.f32.mxu1 %v1229_v0  ;;  %v239_v3 = vld [vmem:[%s1451_s7 + $0x18] sm:$0xff]  ;;  %v238_v4 = vld [vmem:[%s1451_s7 + $0x10] sm:$0xff]  ;;  %v241_v5 = vld [vmem:[%s1451_s7 + $0x28] sm:$0xff]  ;;  %s898_s20 = sshll.u32 %s1447_s25, 9  ;;  %s937_s24 = sshll.u32 %s1214_s15, 13 }
  0x6e   : > { %312 = vxpose.xlu1.b32.start [1/8] (short) %v237_v1, 128  ;;  %280 = vxpose.xlu0.b32.start [1/8] (short) %v236_v2, 128  ;;  %v240_v6 = vld [vmem:[%s1451_s7 + $0x20] sm:$0xff]  ;;  %v253_v7 = vld [vmem:[#allocation5 + $0x8] sm:$0xff]  ;;  %v255_v8 = vld [vmem:[#allocation5 + $0x18] sm:$0xff]  ;;  %s1550_s22 = scalar_lea.vmem [#allocation8], %s898_s20  ;;  %s1675_s8 = scalar_lea.hbm %s1735_s3, %s937_s24 }
  0x6f   : > { %v938_v9 = vpack.c.bf16 %v255_v8, %v253_v7  ;;  %v252_v10 = vld [vmem:[#allocation5] sm:$0xff]  ;;  %v254_v11 = vld [vmem:[#allocation5 + $0x10] sm:$0xff]  ;;  %v257_v12 = vld [vmem:[#allocation5 + $0x28] sm:$0xff]  ;;  %s779_s11 = sshll.u32 %s1550_s22, 4  ;;  %s763_s26 = scalar_lea.sflag [#allocation4], %s1447_s25  ;;  %s1677_s11 = int_to_ptr.vmem [resolvable:$true] %s779_s11 }
  0x70   : > { %v940_v13 = vpack.c.bf16 %v254_v11, %v252_v10  ;;  %v259_v14 = vld [vmem:[#allocation5 + $0x38] sm:$0xff]  ;;  %v256_v15 = vld [vmem:[#allocation5 + $0x20] sm:$0xff]  ;;  %v258_v16 = vld [vmem:[#allocation5 + $0x30] sm:$0xff]  ;;  %v270_v10 = vlaneseq  ;;  %s1136_s9 = scalar_lea.vmem %s1677_s11, 8192  ;;  %p1750_p12 = scmp.ne.s32.totalorder %s1746_s27, 0 }
  0x71   : > { %939 = vmatprep.subr.bf16.mxu0 %v938_v9  ;;  %954 = vmatprep.subr.bf16.mxu1 %v938_v9  ;;  %v942_v17 = vpack.c.bf16 %v259_v14, %v257_v12  ;;  %v261_v18 = vld [vmem:[#allocation5 + $0x48] sm:$0xff]  ;;  %v263_v19 = vld [vmem:[#allocation5 + $0x58] sm:$0xff]  ;;  %v242_v21 = vld [vmem:[%s1451_s7 + $0x30] sm:$0xff]  ;;  %v944_v22 = vpack.c.bf16 %v258_v16, %v256_v15  ;;  %p1137_p8 = scmp.ne.s32.totalorder %s1677_s11, %s1136_s9  ;;  %s1230_s10 = smov [#allocation8]  }
  0x72   : > { %313 = vxpose.xlu1.b32.cont [2/8] (short) %v239_v3, 128  ;;  %281 = vxpose.xlu0.b32.cont [2/8] (short) %v238_v4, 128  ;;  %v243_v20 = vld [vmem:[%s1451_s7 + $0x38] sm:$0xff]  ;;  %v946_v23 = vpack.c.bf16 %v263_v19, %v261_v18  ;;  %v260_v24 = vld [vmem:[#allocation5 + $0x40] sm:$0xff]  ;;  %v262_v25 = vld [vmem:[#allocation5 + $0x50] sm:$0xff]  ;;  %v271_v11 = vshrl.u32 %v270_v10, 7  ;;  %s1140_s30 = sshll.u32 %s1230_s10, 4  ;;  %s1141_s30 = int_to_ptr.vmem [resolvable:$false] %s1140_s30 }
  0x73   : > { %941 = vmatpush1.bf16.msra.mxu0 %v940_v13  ;;  %958 = vmatpush1.bf16.msra.mxu1 %v940_v13  ;;  %v265_v26 = vld [vmem:[#allocation5 + $0x68] sm:$0xff]  ;;  %v267_v27 = vld [vmem:[#allocation5 + $0x78] sm:$0xff]  ;;  %v244_v29 = vld [vmem:[%s1451_s7 + $0x40] sm:$0xff]  ;;  %v948_v30 = vpack.c.bf16 %v262_v25, %v260_v24  ;;  %p1138_p1 = pnand %p1137_p8, %p1750_p12  ;;  %s1142_s21 = scalar_lea.vmem %s1141_s30, 16384 }
  0x74   : > { %943 = vmatprep.subr.bf16.mxu0 %v942_v17  ;;  %955 = vmatprep.subr.bf16.mxu1 %v942_v17  ;;  %v245_v28 = vld [vmem:[%s1451_s7 + $0x48] sm:$0xff]  ;;  %v950_v31 = vpack.c.bf16 %v267_v27, %v265_v26  ;;  %v264_v32 = vld [vmem:[#allocation5 + $0x60] sm:$0xff]  ;;  %v266_v33 = vld [vmem:[#allocation5 + $0x70] sm:$0xff]  ;;  %v272_v12 = vsub.s32 0, %v271_v11  ;;  %v276_v14 = vsub.s32 1, %v271_v11  ;;  %p1143_p3 = scmp.lt.s32.totalorder %s1677_s11, %s1141_s30  ;;  %p1144_p5 = scmp.lt.s32.totalorder %s1142_s21, %s1136_s9 }
  0x75   : > { %v247_v34 = vld [vmem:[%s1451_s7 + $0x58] sm:$0xff]  ;;  %v246_v35 = vld [vmem:[%s1451_s7 + $0x50] sm:$0xff]  ;;  %v952_v36 = vpack.c.bf16 %v266_v33, %v264_v32  ;;  %v249_v37 = vld [vmem:[%s1451_s7 + $0x68] sm:$0xff]  ;;  %p1139_p10 = pneg %p1138_p1 }
  0x76   : > { %314 = vxpose.xlu1.b32.cont [3/8] (short) %v241_v5, 128  ;;  %282 = vxpose.xlu0.b32.cont [3/8] (short) %v240_v6, 128  ;;  %v248_v38 = vld [vmem:[%s1451_s7 + $0x60] sm:$0xff]  ;;  %v251_v39 = vld [vmem:[%s1451_s7 + $0x78] sm:$0xff]  ;;  %v250_v40 = vld [vmem:[%s1451_s7 + $0x70] sm:$0xff]  ;;  %p1145_p9 = por %p1144_p5, %p1143_p3 }
  0x77   : > { %945 = vmatpush1.bf16.msra.mxu0 %v944_v22  ;;  %959 = vmatpush1.bf16.msra.mxu1 %v944_v22  ;;  %v268_v13 = vld [vmem:[#allocation7] sm:$0x3] }
  0x78   : > { %947 = vmatprep.subr.bf16.mxu0 %v946_v23  ;;  %956 = vmatprep.subr.bf16.mxu1 %v946_v23  ;;  %v1542_v15 = vrot.slane %v268_v13, %v272_v12  ;;  %v1544_v16 = vrot.slane %v268_v13, %v276_v14  ;;  %p1146_p11 = pnand %p1145_p9, %p1139_p10 }
  0x7a   : > { %315 = vxpose.xlu1.b32.cont [4/8] (short) %v243_v20, 128  ;;  %283 = vxpose.xlu0.b32.cont [4/8] (short) %v242_v21, 128 }
  0x7b   : > { %949 = vmatpush1.bf16.msra.mxu0 %v948_v30  ;;  %960 = vmatpush1.bf16.msra.mxu1 %v948_v30 }
  0x7c   : > { %951 = vmatprep.subr.bf16.mxu0 %v950_v31  ;;  %957 = vmatprep.subr.bf16.mxu1 %v950_v31 }
  0x7e   : > { %316 = vxpose.xlu1.b32.cont [5/8] (short) %v245_v28, 128  ;;  %284 = vxpose.xlu0.b32.cont [5/8] (short) %v244_v29, 128 }
  0x7f   : > { %953 = vmatpush1.bf16.msra.mxu0 %v952_v36  ;;  %961 = vmatpush1.bf16.msra.mxu1 %v952_v36 }
  0x82   : > { %317 = vxpose.xlu1.b32.cont [6/8] (short) %v247_v34, 128  ;;  %285 = vxpose.xlu0.b32.cont [6/8] (short) %v246_v35, 128 }
  0x86   : > { %318 = vxpose.xlu1.b32.cont [7/8] (short) %v249_v37, 128  ;;  %286 = vxpose.xlu0.b32.cont [7/8] (short) %v248_v38, 128 }
  0x8a   : > { %319 = vxpose.xlu1.b32.end [8/8] (short) %v251_v39, 128  ;;  %287 = vxpose.xlu0.b32.end [8/8] (short) %v250_v40, 128 }
  0xee   : > { %v328_v41 = vpop.trf.xlu1  ;;  %v296_v42 = vpop.trf.xlu0 }
  0xef   : > { %899 = vmatmul.mubr.msk.f32.vlgmr.msra.gmra.mrb[0].mxu0 %vm344_vm0, %v296_v42  ;;  %915 = vmatmul.mubr.msk.f32.vlgmr.msra.gmra.mrb[0].mxu1 %vm344_vm0, %v328_v41 }
  0xf0   : > { %607 = vmatprep.mubr.f32.mxu1 %v1229_v0  ;;  %511 = vmatprep.mubr.f32.mxu0 %v1229_v0 }
  0xf2   : > { %v329_v43 = vpop.trf.xlu1  ;;  %v297_v44 = vpop.trf.xlu0 }
  0xf3   : > { %900 = vmatmul.mubr.msk.f32.gmra.mrb[2].mxu0 %vm344_vm0, %v297_v44  ;;  %916 = vmatmul.mubr.msk.f32.gmra.mrb[2].mxu1 %vm344_vm0, %v329_v43 }
  0xf4   : > { %613 = vmatprep.mubr.f32.mxu1 %v1229_v0  ;;  %517 = vmatprep.mubr.f32.mxu0 %v1229_v0 }
  0xf6   : > { %v330_v45 = vpop.trf.xlu1  ;;  %v298_v46 = vpop.trf.xlu0 }
  0xf7   : > { %901 = vmatmul.mubr.msk.f32.gmra.mrb[4].mxu0 %vm344_vm0, %v298_v46  ;;  %917 = vmatmul.mubr.msk.f32.gmra.mrb[4].mxu1 %vm344_vm0, %v330_v45 }
  0xf8   : > { %619 = vmatprep.mubr.f32.mxu1 %v1229_v0  ;;  %523 = vmatprep.mubr.f32.mxu0 %v1229_v0 }
  0xfa   : > { %v331_v47 = vpop.trf.xlu1  ;;  %v299_v48 = vpop.trf.xlu0 }
  0xfb   : > { %902 = vmatmul.mubr.msk.f32.gmra.mrb[6].mxu0 %vm344_vm0, %v299_v48  ;;  %918 = vmatmul.mubr.msk.f32.gmra.mrb[6].mxu1 %vm344_vm0, %v331_v47 }
  0xfc   : > { %625 = vmatprep.mubr.f32.mxu1 %v1229_v0  ;;  %529 = vmatprep.mubr.f32.mxu0 %v1229_v0 }
  0xfe   : > { %v332_v49 = vpop.trf.xlu1  ;;  %v300_v50 = vpop.trf.xlu0 }
  0xff   : > { %903 = vmatmul.mubr.msk.f32.gmra.mrb[8].mxu0 %vm344_vm0, %v300_v50  ;;  %919 = vmatmul.mubr.msk.f32.gmra.mrb[8].mxu1 %vm344_vm0, %v332_v49 }
 0x100   : > { %631 = vmatprep.mubr.f32.mxu1 %v1229_v0  ;;  %535 = vmatprep.mubr.f32.mxu0 %v1229_v0 }
 0x102   : > { %v333_v51 = vpop.trf.xlu1  ;;  %v301_v52 = vpop.trf.xlu0 }
 0x103   : > { %904 = vmatmul.mubr.msk.f32.gmra.mrb[10].mxu0 %vm344_vm0, %v301_v52  ;;  %920 = vmatmul.mubr.msk.f32.gmra.mrb[10].mxu1 %vm344_vm0, %v333_v51 }
 0x104   : > { %637 = vmatprep.mubr.f32.mxu1 %v1229_v0  ;;  %541 = vmatprep.mubr.f32.mxu0 %v1229_v0 }
 0x106   : > { %v334_v53 = vpop.trf.xlu1  ;;  %v302_v54 = vpop.trf.xlu0 }
 0x107   : > { %905 = vmatmul.mubr.msk.f32.gmra.mrb[12].mxu0 %vm344_vm0, %v302_v54  ;;  %921 = vmatmul.mubr.msk.f32.gmra.mrb[12].mxu1 %vm344_vm0, %v334_v53 }
 0x108   : > { %643 = vmatprep.mubr.f32.mxu1 %v1229_v0  ;;  %547 = vmatprep.mubr.f32.mxu0 %v1229_v0 }
 0x10a   : > { %v335_v55 = vpop.trf.xlu1  ;;  %v303_v56 = vpop.trf.xlu0 }
 0x10b   : > { %906 = vmatmul.mubr.msk.f32.gmra.mrb[14].mxu0 %vm344_vm0, %v303_v56  ;;  %922 = vmatmul.mubr.msk.f32.gmra.mrb[14].mxu1 %vm344_vm0, %v335_v55 }
 0x10c   : > { %649 = vmatprep.mubr.f32.mxu1 %v1229_v0  ;;  %553 = vmatprep.mubr.f32.mxu0 %v1229_v0 }
 0x10e   : > { %v336_v57 = vpop.trf.xlu1  ;;  %v304_v58 = vpop.trf.xlu0 }
 0x10f   : > { %907 = vmatmul.mubr.msk.f32.gmra.mrb[16].mxu0 %vm344_vm0, %v304_v58  ;;  %923 = vmatmul.mubr.msk.f32.gmra.mrb[16].mxu1 %vm344_vm0, %v336_v57 }
 0x110   : > { %655 = vmatprep.mubr.f32.mxu1 %v1229_v0  ;;  %559 = vmatprep.mubr.f32.mxu0 %v1229_v0 }
 0x112   : > { %v337_v59 = vpop.trf.xlu1  ;;  %v305_v60 = vpop.trf.xlu0 }
 0x113   : > { %908 = vmatmul.mubr.msk.f32.gmra.mrb[18].mxu0 %vm344_vm0, %v305_v60  ;;  %924 = vmatmul.mubr.msk.f32.gmra.mrb[18].mxu1 %vm344_vm0, %v337_v59 }
 0x114   : > { %661 = vmatprep.mubr.f32.mxu1 %v1229_v0  ;;  %565 = vmatprep.mubr.f32.mxu0 %v1229_v0 }
 0x116   : > { %v338_v61 = vpop.trf.xlu1  ;;  %v306_v62 = vpop.trf.xlu0 }
 0x117   : > { %909 = vmatmul.mubr.msk.f32.gmra.mrb[20].mxu0 %vm344_vm0, %v306_v62  ;;  %925 = vmatmul.mubr.msk.f32.gmra.mrb[20].mxu1 %vm344_vm0, %v338_v61 }
 0x118   : > { %667 = vmatprep.mubr.f32.mxu1 %v1229_v0  ;;  %571 = vmatprep.mubr.f32.mxu0 %v1229_v0 }
 0x11a   : > { %v339_v63 = vpop.trf.xlu1  ;;  %v307_v1 = vpop.trf.xlu0 }
 0x11b   : > { %910 = vmatmul.mubr.msk.f32.gmra.mrb[22].mxu0 %vm344_vm0, %v307_v1  ;;  %926 = vmatmul.mubr.msk.f32.gmra.mrb[22].mxu1 %vm344_vm0, %v339_v63 }
 0x11c   : > { %673 = vmatprep.mubr.f32.mxu1 %v1229_v0  ;;  %577 = vmatprep.mubr.f32.mxu0 %v1229_v0 }
 0x11e   : > { %v340_v2 = vpop.trf.xlu1  ;;  %v308_v3 = vpop.trf.xlu0 }
 0x11f   : > { %911 = vmatmul.mubr.msk.f32.gmra.mrb[24].mxu0 %vm344_vm0, %v308_v3  ;;  %927 = vmatmul.mubr.msk.f32.gmra.mrb[24].mxu1 %vm344_vm0, %v340_v2 }
 0x120   : > { %679 = vmatprep.mubr.f32.mxu1 %v1229_v0  ;;  %583 = vmatprep.mubr.f32.mxu0 %v1229_v0 }
 0x122   : > { %v341_v4 = vpop.trf.xlu1  ;;  %v309_v5 = vpop.trf.xlu0 }
 0x123   : > { %912 = vmatmul.mubr.msk.f32.gmra.mrb[26].mxu0 %vm344_vm0, %v309_v5  ;;  %928 = vmatmul.mubr.msk.f32.gmra.mrb[26].mxu1 %vm344_vm0, %v341_v4 }
 0x124   : > { %685 = vmatprep.mubr.f32.mxu1 %v1229_v0  ;;  %589 = vmatprep.mubr.f32.mxu0 %v1229_v0 }
 0x126   : > { %v342_v6 = vpop.trf.xlu1  ;;  %v310_v7 = vpop.trf.xlu0 }
 0x127   : > { %913 = vmatmul.mubr.msk.f32.gmra.mrb[28].mxu0 %vm344_vm0, %v310_v7  ;;  %929 = vmatmul.mubr.msk.f32.gmra.mrb[28].mxu1 %vm344_vm0, %v342_v6 }
 0x128   : > { %691 = vmatprep.mubr.f32.mxu1 %v1229_v0  ;;  %595 = vmatprep.mubr.f32.mxu0 %v1229_v0 }
 0x12a   : > { %v343_v8 = vpop.trf.xlu1  ;;  %v311_v9 = vpop.trf.xlu0 }
 0x12b   : > { %914 = vmatmul.mubr.msk.f32.gmra.mrb[30].mxu0 %vm344_vm0, %v311_v9  ;;  %930 = vmatmul.mubr.msk.f32.gmra.mrb[30].mxu1 %vm344_vm0, %v343_v8 }
 0x1c2   : > { %v507_v17 = vpop.f32.mrb[0].mxu0  ;;  %v603_v18 = vpop.f32.mrb[0].mxu1 }
 0x1c3   : > { %v508_v0 = vadd.f32 %v507_v17, %v1542_v15  ;;  %v604_v19 = vadd.f32 %v603_v18, %v1542_v15  ;;  %v509_v20 = vpop.f32.mrb[1].mxu0  ;;  %v605_v21 = vpop.f32.mrb[1].mxu1 }
 0x1c4   : > { %v510_v22 = vadd.f32 %v509_v20, %v1544_v16  ;;  %v606_v23 = vadd.f32 %v605_v21, %v1544_v16 }
 0x1c5   : > { %698 = vst [vmem:[%s1550_s22] sm:$0xff] %v508_v0  ;;  %730 = vst [vmem:[%s1550_s22 + $0x100] sm:$0xff] %v604_v19 }
 0x1c6   : > { %699 = vst [vmem:[%s1550_s22 + $0x8] sm:$0xff] %v510_v22  ;;  %731 = vst [vmem:[%s1550_s22 + $0x108] sm:$0xff] %v606_v23  ;;  %v513_v24 = vpop.f32.mrb[2].mxu0  ;;  %v609_v25 = vpop.f32.mrb[2].mxu1 }
 0x1c7   : > { %v514_v26 = vadd.f32 %v513_v24, %v1542_v15  ;;  %v610_v27 = vadd.f32 %v609_v25, %v1542_v15  ;;  %v515_v28 = vpop.f32.mrb[3].mxu0  ;;  %v611_v29 = vpop.f32.mrb[3].mxu1 }
 0x1c8   : > { %v516_v30 = vadd.f32 %v515_v28, %v1544_v16  ;;  %v612_v31 = vadd.f32 %v611_v29, %v1544_v16 }
 0x1c9   : > { %700 = vst [vmem:[%s1550_s22 + $0x10] sm:$0xff] %v514_v26  ;;  %732 = vst [vmem:[%s1550_s22 + $0x110] sm:$0xff] %v610_v27 }
 0x1ca   : > { %701 = vst [vmem:[%s1550_s22 + $0x18] sm:$0xff] %v516_v30  ;;  %733 = vst [vmem:[%s1550_s22 + $0x118] sm:$0xff] %v612_v31  ;;  %v519_v32 = vpop.f32.mrb[4].mxu0  ;;  %v615_v33 = vpop.f32.mrb[4].mxu1 }
 0x1cb   : > { %v520_v34 = vadd.f32 %v519_v32, %v1542_v15  ;;  %v616_v35 = vadd.f32 %v615_v33, %v1542_v15  ;;  %v521_v36 = vpop.f32.mrb[5].mxu0  ;;  %v617_v37 = vpop.f32.mrb[5].mxu1 }
 0x1cc   : > { %v522_v38 = vadd.f32 %v521_v36, %v1544_v16  ;;  %v618_v39 = vadd.f32 %v617_v37, %v1544_v16 }
 0x1cd   : > { %702 = vst [vmem:[%s1550_s22 + $0x20] sm:$0xff] %v520_v34  ;;  %734 = vst [vmem:[%s1550_s22 + $0x120] sm:$0xff] %v616_v35 }
 0x1ce   : > { %703 = vst [vmem:[%s1550_s22 + $0x28] sm:$0xff] %v522_v38  ;;  %735 = vst [vmem:[%s1550_s22 + $0x128] sm:$0xff] %v618_v39  ;;  %v525_v40 = vpop.f32.mrb[6].mxu0  ;;  %v621_v41 = vpop.f32.mrb[6].mxu1 }
 0x1cf   : > { %v526_v42 = vadd.f32 %v525_v40, %v1542_v15  ;;  %v622_v43 = vadd.f32 %v621_v41, %v1542_v15  ;;  %v527_v44 = vpop.f32.mrb[7].mxu0  ;;  %v623_v45 = vpop.f32.mrb[7].mxu1 }
 0x1d0   : > { %v528_v46 = vadd.f32 %v527_v44, %v1544_v16  ;;  %v624_v47 = vadd.f32 %v623_v45, %v1544_v16 }
 0x1d1   : > { %704 = vst [vmem:[%s1550_s22 + $0x30] sm:$0xff] %v526_v42  ;;  %736 = vst [vmem:[%s1550_s22 + $0x130] sm:$0xff] %v622_v43 }
 0x1d2   : > { %705 = vst [vmem:[%s1550_s22 + $0x38] sm:$0xff] %v528_v46  ;;  %737 = vst [vmem:[%s1550_s22 + $0x138] sm:$0xff] %v624_v47  ;;  %v531_v48 = vpop.f32.mrb[8].mxu0  ;;  %v627_v49 = vpop.f32.mrb[8].mxu1 }
 0x1d3   : > { %v532_v50 = vadd.f32 %v531_v48, %v1542_v15  ;;  %v628_v51 = vadd.f32 %v627_v49, %v1542_v15  ;;  %v533_v52 = vpop.f32.mrb[9].mxu0  ;;  %v629_v53 = vpop.f32.mrb[9].mxu1 }
 0x1d4   : > { %v534_v54 = vadd.f32 %v533_v52, %v1544_v16  ;;  %v630_v55 = vadd.f32 %v629_v53, %v1544_v16 }
 0x1d5   : > { %706 = vst [vmem:[%s1550_s22 + $0x40] sm:$0xff] %v532_v50  ;;  %738 = vst [vmem:[%s1550_s22 + $0x140] sm:$0xff] %v628_v51 }
 0x1d6   : > { %707 = vst [vmem:[%s1550_s22 + $0x48] sm:$0xff] %v534_v54  ;;  %739 = vst [vmem:[%s1550_s22 + $0x148] sm:$0xff] %v630_v55  ;;  %v537_v56 = vpop.f32.mrb[10].mxu0  ;;  %v633_v57 = vpop.f32.mrb[10].mxu1 }
 0x1d7   : > { %v538_v58 = vadd.f32 %v537_v56, %v1542_v15  ;;  %v634_v59 = vadd.f32 %v633_v57, %v1542_v15  ;;  %v539_v60 = vpop.f32.mrb[11].mxu0  ;;  %v635_v61 = vpop.f32.mrb[11].mxu1 }
 0x1d8   : > { %v540_v62 = vadd.f32 %v539_v60, %v1544_v16  ;;  %v636_v63 = vadd.f32 %v635_v61, %v1544_v16 }
 0x1d9   : > { %708 = vst [vmem:[%s1550_s22 + $0x50] sm:$0xff] %v538_v58  ;;  %740 = vst [vmem:[%s1550_s22 + $0x150] sm:$0xff] %v634_v59 }
 0x1da   : > { %709 = vst [vmem:[%s1550_s22 + $0x58] sm:$0xff] %v540_v62  ;;  %741 = vst [vmem:[%s1550_s22 + $0x158] sm:$0xff] %v636_v63  ;;  %v543_v1 = vpop.f32.mrb[12].mxu0  ;;  %v639_v2 = vpop.f32.mrb[12].mxu1 }
 0x1db   : > { %v544_v3 = vadd.f32 %v543_v1, %v1542_v15  ;;  %v640_v4 = vadd.f32 %v639_v2, %v1542_v15  ;;  %v545_v5 = vpop.f32.mrb[13].mxu0  ;;  %v641_v6 = vpop.f32.mrb[13].mxu1 }
 0x1dc   : > { %v546_v7 = vadd.f32 %v545_v5, %v1544_v16  ;;  %v642_v8 = vadd.f32 %v641_v6, %v1544_v16 }
 0x1dd   : > { %710 = vst [vmem:[%s1550_s22 + $0x60] sm:$0xff] %v544_v3  ;;  %742 = vst [vmem:[%s1550_s22 + $0x160] sm:$0xff] %v640_v4 }
 0x1de   : > { %711 = vst [vmem:[%s1550_s22 + $0x68] sm:$0xff] %v546_v7  ;;  %743 = vst [vmem:[%s1550_s22 + $0x168] sm:$0xff] %v642_v8  ;;  %v549_v9 = vpop.f32.mrb[14].mxu0  ;;  %v645_v10 = vpop.f32.mrb[14].mxu1 }
 0x1df   : > { %v550_v11 = vadd.f32 %v549_v9, %v1542_v15  ;;  %v646_v12 = vadd.f32 %v645_v10, %v1542_v15  ;;  %v551_v13 = vpop.f32.mrb[15].mxu0  ;;  %v647_v14 = vpop.f32.mrb[15].mxu1 }
 0x1e0   : > { %v552_v17 = vadd.f32 %v551_v13, %v1544_v16  ;;  %v648_v18 = vadd.f32 %v647_v14, %v1544_v16 }
 0x1e1   : > { %712 = vst [vmem:[%s1550_s22 + $0x70] sm:$0xff] %v550_v11  ;;  %744 = vst [vmem:[%s1550_s22 + $0x170] sm:$0xff] %v646_v12 }
 0x1e2   : > { %713 = vst [vmem:[%s1550_s22 + $0x78] sm:$0xff] %v552_v17  ;;  %745 = vst [vmem:[%s1550_s22 + $0x178] sm:$0xff] %v648_v18  ;;  %v555_v0 = vpop.f32.mrb[16].mxu0  ;;  %v651_v19 = vpop.f32.mrb[16].mxu1 }
 0x1e3   : > { %v556_v20 = vadd.f32 %v555_v0, %v1542_v15  ;;  %v652_v21 = vadd.f32 %v651_v19, %v1542_v15  ;;  %v557_v22 = vpop.f32.mrb[17].mxu0  ;;  %v653_v23 = vpop.f32.mrb[17].mxu1 }
 0x1e4   : > { %v558_v24 = vadd.f32 %v557_v22, %v1544_v16  ;;  %v654_v25 = vadd.f32 %v653_v23, %v1544_v16 }
 0x1e5   : > { %714 = vst [vmem:[%s1550_s22 + $0x80] sm:$0xff] %v556_v20  ;;  %746 = vst [vmem:[%s1550_s22 + $0x180] sm:$0xff] %v652_v21 }
 0x1e6   : > { %715 = vst [vmem:[%s1550_s22 + $0x88] sm:$0xff] %v558_v24  ;;  %747 = vst [vmem:[%s1550_s22 + $0x188] sm:$0xff] %v654_v25  ;;  %v561_v26 = vpop.f32.mrb[18].mxu0  ;;  %v657_v27 = vpop.f32.mrb[18].mxu1 }
 0x1e7   : > { %v562_v28 = vadd.f32 %v561_v26, %v1542_v15  ;;  %v658_v29 = vadd.f32 %v657_v27, %v1542_v15  ;;  %v563_v30 = vpop.f32.mrb[19].mxu0  ;;  %v659_v31 = vpop.f32.mrb[19].mxu1 }
 0x1e8   : > { %v564_v32 = vadd.f32 %v563_v30, %v1544_v16  ;;  %v660_v33 = vadd.f32 %v659_v31, %v1544_v16 }
 0x1e9   : > { %716 = vst [vmem:[%s1550_s22 + $0x90] sm:$0xff] %v562_v28  ;;  %748 = vst [vmem:[%s1550_s22 + $0x190] sm:$0xff] %v658_v29 }
 0x1ea   : > { %717 = vst [vmem:[%s1550_s22 + $0x98] sm:$0xff] %v564_v32  ;;  %749 = vst [vmem:[%s1550_s22 + $0x198] sm:$0xff] %v660_v33  ;;  %v567_v34 = vpop.f32.mrb[20].mxu0  ;;  %v663_v35 = vpop.f32.mrb[20].mxu1 }
 0x1eb   : > { %v568_v36 = vadd.f32 %v567_v34, %v1542_v15  ;;  %v664_v37 = vadd.f32 %v663_v35, %v1542_v15  ;;  %v569_v38 = vpop.f32.mrb[21].mxu0  ;;  %v665_v39 = vpop.f32.mrb[21].mxu1 }
 0x1ec   : > { %v570_v40 = vadd.f32 %v569_v38, %v1544_v16  ;;  %v666_v41 = vadd.f32 %v665_v39, %v1544_v16 }
 0x1ed   : > { %718 = vst [vmem:[%s1550_s22 + $0xa0] sm:$0xff] %v568_v36  ;;  %750 = vst [vmem:[%s1550_s22 + $0x1a0] sm:$0xff] %v664_v37 }
 0x1ee   : > { %719 = vst [vmem:[%s1550_s22 + $0xa8] sm:$0xff] %v570_v40  ;;  %751 = vst [vmem:[%s1550_s22 + $0x1a8] sm:$0xff] %v666_v41  ;;  %v573_v42 = vpop.f32.mrb[22].mxu0  ;;  %v669_v43 = vpop.f32.mrb[22].mxu1 }
 0x1ef   : > { %v574_v44 = vadd.f32 %v573_v42, %v1542_v15  ;;  %v670_v45 = vadd.f32 %v669_v43, %v1542_v15  ;;  %v575_v46 = vpop.f32.mrb[23].mxu0  ;;  %v671_v47 = vpop.f32.mrb[23].mxu1 }
 0x1f0   : > { %v576_v48 = vadd.f32 %v575_v46, %v1544_v16  ;;  %v672_v49 = vadd.f32 %v671_v47, %v1544_v16 }
 0x1f1   : > { %720 = vst [vmem:[%s1550_s22 + $0xb0] sm:$0xff] %v574_v44  ;;  %752 = vst [vmem:[%s1550_s22 + $0x1b0] sm:$0xff] %v670_v45 }
 0x1f2   : > { %721 = vst [vmem:[%s1550_s22 + $0xb8] sm:$0xff] %v576_v48  ;;  %753 = vst [vmem:[%s1550_s22 + $0x1b8] sm:$0xff] %v672_v49  ;;  %v579_v50 = vpop.f32.mrb[24].mxu0  ;;  %v675_v51 = vpop.f32.mrb[24].mxu1 }
 0x1f3   : > { %v580_v52 = vadd.f32 %v579_v50, %v1542_v15  ;;  %v676_v53 = vadd.f32 %v675_v51, %v1542_v15  ;;  %v581_v54 = vpop.f32.mrb[25].mxu0  ;;  %v677_v55 = vpop.f32.mrb[25].mxu1 }
 0x1f4   : > { %v582_v56 = vadd.f32 %v581_v54, %v1544_v16  ;;  %v678_v57 = vadd.f32 %v677_v55, %v1544_v16 }
 0x1f5   : > { %722 = vst [vmem:[%s1550_s22 + $0xc0] sm:$0xff] %v580_v52  ;;  %754 = vst [vmem:[%s1550_s22 + $0x1c0] sm:$0xff] %v676_v53 }
 0x1f6   : > { %723 = vst [vmem:[%s1550_s22 + $0xc8] sm:$0xff] %v582_v56  ;;  %755 = vst [vmem:[%s1550_s22 + $0x1c8] sm:$0xff] %v678_v57  ;;  %v585_v58 = vpop.f32.mrb[26].mxu0  ;;  %v681_v59 = vpop.f32.mrb[26].mxu1 }
 0x1f7   : > { %v586_v60 = vadd.f32 %v585_v58, %v1542_v15  ;;  %v682_v61 = vadd.f32 %v681_v59, %v1542_v15  ;;  %v587_v62 = vpop.f32.mrb[27].mxu0  ;;  %v683_v63 = vpop.f32.mrb[27].mxu1 }
 0x1f8   : > { %v588_v1 = vadd.f32 %v587_v62, %v1544_v16  ;;  %v684_v2 = vadd.f32 %v683_v63, %v1544_v16 }
 0x1f9   : > { %724 = vst [vmem:[%s1550_s22 + $0xd0] sm:$0xff] %v586_v60  ;;  %756 = vst [vmem:[%s1550_s22 + $0x1d0] sm:$0xff] %v682_v61 }
 0x1fa   : > { %725 = vst [vmem:[%s1550_s22 + $0xd8] sm:$0xff] %v588_v1  ;;  %757 = vst [vmem:[%s1550_s22 + $0x1d8] sm:$0xff] %v684_v2  ;;  %v591_v3 = vpop.f32.mrb[28].mxu0  ;;  %v687_v4 = vpop.f32.mrb[28].mxu1 }
 0x1fb   : > { %v592_v5 = vadd.f32 %v591_v3, %v1542_v15  ;;  %v688_v6 = vadd.f32 %v687_v4, %v1542_v15  ;;  %v593_v7 = vpop.f32.mrb[29].mxu0  ;;  %v689_v8 = vpop.f32.mrb[29].mxu1 }
 0x1fc   : > { %v594_v9 = vadd.f32 %v593_v7, %v1544_v16  ;;  %v690_v10 = vadd.f32 %v689_v8, %v1544_v16 }
 0x1fd   : > { %726 = vst [vmem:[%s1550_s22 + $0xe0] sm:$0xff] %v592_v5  ;;  %758 = vst [vmem:[%s1550_s22 + $0x1e0] sm:$0xff] %v688_v6 }
 0x1fe   : > { %727 = vst [vmem:[%s1550_s22 + $0xe8] sm:$0xff] %v594_v9  ;;  %759 = vst [vmem:[%s1550_s22 + $0x1e8] sm:$0xff] %v690_v10  ;;  %v597_v11 = vpop.f32.mrb[30].mxu0  ;;  %v693_v12 = vpop.f32.mrb[30].mxu1 }
 0x1ff   : > { %v598_v13 = vadd.f32 %v597_v11, %v1542_v15  ;;  %v694_v14 = vadd.f32 %v693_v12, %v1542_v15  ;;  %v599_v17 = vpop.f32.mrb[31].mxu0  ;;  %v695_v18 = vpop.f32.mrb[31].mxu1 }
 0x200   : > { %v600_v0 = vadd.f32 %v599_v17, %v1544_v16  ;;  %v696_v19 = vadd.f32 %v695_v18, %v1544_v16 }
 0x201   : > { %728 = vst [vmem:[%s1550_s22 + $0xf0] sm:$0xff] %v598_v13  ;;  %760 = vst [vmem:[%s1550_s22 + $0x1f0] sm:$0xff] %v694_v14 }
 0x202   : > { %729 = vst [vmem:[%s1550_s22 + $0xf8] sm:$0xff] %v600_v0  ;;  %761 = vst [vmem:[%s1550_s22 + $0x1f8] sm:$0xff] %v696_v19 }
 0x203   : > { %1149 = shalt.err (!%p1146_p11)
}
 0x204   : > { %s1150_s28 = scalar_lea.hbm %s1675_s8, 8192  ;;  %s1154_s6 = scalar_lea.hbm %s1735_s3, 16384 }
 0x205   : > { %p1151_p0 = scmp.ne.s32.totalorder %s1675_s8, %s1150_s28  ;;  %p1155_p6 = scmp.lt.u32.totalorder %s1675_s8, %s1735_s3 }
 0x206   : > { %p1156_p7 = scmp.lt.u32.totalorder %s1154_s6, %s1150_s28  ;;  %p1158_p8 = scmp.lt.u32.totalorder %s1150_s28, %s1675_s8 }
 0x207   : > { %p1152_p4 = pnand %p1151_p0, %p1750_p12 }
 0x208   : > { %p1157_p2 = por %p1156_p7, %p1155_p6 }
 0x209   : > { %p1153_p13 = pneg %p1152_p4 }
 0x20a   : > { %p1159_p1 = por %p1158_p8, %p1157_p2 }
 0x20c   : > { %p1160_p10 = pnand %p1159_p1, %p1153_p13 }
 0x20e   : > { %1163 = shalt.err (!%p1160_p10)
}
 0x20f   : > { %s1231_s22 = smov 256   ;;  %s1232_s24 = smov 16  }
 0x210   : > { %972 = dma.vmem_to_hbm [thread:$0]  (%p1750_p12), %s1677_s11, 8192, %s1675_s8, %s763_s26, %s1231_s22, %s1231_s22, %s1232_s24  }
 0x211 PF: > { %s794_s15 = sand.u32 1, %s1202_s12   ;;  %p1751_p3 = scmp.ne.s32.totalorder %s1743_s23, 0 }
 0x212   : > { %p1752_p5 = scmp.ge.s32.totalorder %s1222_s17, 2  ;;  %s795_s18 = scalar_lea.sflag [#allocation4], %s794_s15 }
 0x214   : > { %p986_p9 = pnand %p1752_p5, %p1751_p3 }
 0x216   : > { %1197 = dma.done.wait (!%p986_p9), %s795_s18, 8192  }
 0x217   : > { %1199 = vsyncadd (!%p986_p9), %s795_s18, 4294959104  ;;  %s20_s17 = sadd.s32 1, %s1222_s17   ;;  %s1753_s12 = smov %s1206_s13 }
 0x218   : > { %p17_p11 = scmp.ge.s32.totalorder %s20_s17, 4   ;;  %s1754_s13 = smov %s1210_s14 }
 0x219   : > { %s1755_s14 = smov %s1398_s5  ;;  %s1756_s15 = smov %s1218_s16 }
 0x21a   : > { %s1757_s16 = smov %s1759_s19  ;;  %19 = sbr.rel (!%p17_p11) target bundleno = 7 (0x7), region = 85 }
 0x221   :  { %800 = vsyncpa [#allocation3], 1 }
 0x222   :  { %802 = vsyncpa [#allocation3 + $0x1], 1 }
 0x223   :  { %803 = vsyncpa [#allocation6], 1 }
 0x224   :  { %804 = vsyncpa [#allocation4], 1 }
 0x225   :  { %806 = vsyncpa [#allocation4 + $0x1], 1 }

</bundles_post_ra>
